<compile_context>
chip_gen: v6e
topology: v6e:2x2x1
jax: 0.10.0
libtpu: 0.0.40
codegen_flags: <defaults>
</compile_context>

<pallas_src>
import jax
import jax.numpy as jnp
from jax.experimental import pallas as pl
from jax.experimental.pallas import tpu as pltpu


def termination_kernel(x_ref, w1_ref, b1_ref, w2_ref, b2_ref, o_ref):
    # Layer 1: Linear + Tanh  (MXU matmul, f32 accumulate; activations in f32).
    h = jnp.dot(x_ref[...], w1_ref[...], preferred_element_type=jnp.float32)
    h = jnp.tanh(h + b1_ref[...].astype(jnp.float32))
    # Layer 2: Linear(hidden, 1) as VPU multiply + lane reduce (avoids a
    # degenerate single-column MXU matmul). w2_ref is a (1, hidden) row.
    z = jnp.sum(h * w2_ref[...].astype(jnp.float32), axis=-1, keepdims=True)
    z = z + b2_ref[0, 0]  # scalar bias from SMEM
    o_ref[...] = jax.nn.sigmoid(z).astype(o_ref.dtype)


def termination_forward(x, w1, b1, w2, b2, *, block_rows=1024):
    """x: (B, obs_dim); w1: (obs_dim, hidden); b1: (1, hidden);
    w2: (1, hidden)  [PyTorch Linear(hidden,1).weight layout]; b2: (1, 1)
    -> (B, 1) sigmoid termination probability."""
    B, obs_dim = x.shape
    hidden = w1.shape[1]

    # Batch tile: multiple of 8 (sublane constraint), capped at block_rows,
    # and no larger than the (8-rounded) batch so small batches use one step.
    tb = min(block_rows, pl.cdiv(B, 8) * 8)
    tb = max(8, (tb // 8) * 8)
    n_blocks = pl.cdiv(B, tb)
    b_pad = n_blocks * tb
    if b_pad != B:
        x = jnp.pad(x, ((0, b_pad - B), (0, 0)))  # padded rows discarded below

    out = pl.pallas_call(
        termination_kernel,
        out_shape=jax.ShapeDtypeStruct((b_pad, 1), x.dtype),
        grid=(n_blocks,),
        in_specs=[
            pl.BlockSpec((tb, obs_dim), lambda i: (i, 0)),        # x: streamed
            pl.BlockSpec((obs_dim, hidden), lambda i: (0, 0)),    # w1: resident
            pl.BlockSpec((1, hidden), lambda i: (0, 0)),          # b1: resident
            pl.BlockSpec((1, hidden), lambda i: (0, 0)),          # w2 row: resident
            pl.BlockSpec((1, 1), lambda i: (0, 0),                # b2: scalar in SMEM
                         memory_space=pltpu.MemorySpace.SMEM),
        ],
        out_specs=pl.BlockSpec((tb, 1), lambda i: (i, 0)),
        compiler_params=pltpu.CompilerParams(
            dimension_semantics=("parallel",)),  # lets v7x shard batch over 2 TCs
    )(x, w1, b1, w2, b2)
    return out[:B]


def init_params(key, observation_dim, hidden_dim):
    """Deterministic PyTorch-Linear-style init (U(-1/sqrt(fan_in), 1/sqrt(fan_in))).
    w1 is stored transposed to (in, out); w2 keeps PyTorch's (1, hidden) layout."""
    k1, k2, k3, k4 = jax.random.split(key, 4)
    bound1 = 1.0 / jnp.sqrt(observation_dim)
    bound2 = 1.0 / jnp.sqrt(hidden_dim)
    w1 = jax.random.uniform(k1, (observation_dim, hidden_dim),
                            jnp.float32, -bound1, bound1)
    b1 = jax.random.uniform(k2, (1, hidden_dim), jnp.float32, -bound1, bound1)
    w2 = jax.random.uniform(k3, (1, hidden_dim), jnp.float32, -bound2, bound2)
    b2 = jax.random.uniform(k4, (1, 1), jnp.float32, -bound2, bound2)
    return w1, b1, w2, b2


def _reference(x, w1, b1, w2, b2):
    return jax.nn.sigmoid(jnp.tanh(x @ w1 + b1) @ w2.T + b2)


if __name__ == "__main__":
    observation_dim = 16
    hidden_dim = 32

    key = jax.random.PRNGKey(0)
    kx, kp, kx2 = jax.random.split(key, 3)
    w1, b1, w2, b2 = init_params(kp, observation_dim, hidden_dim)

    # Small batch: single grid step.
    batch = 8
    x = jax.random.normal(kx, (batch, observation_dim), jnp.float32)
    out = jax.block_until_ready(termination_forward(x, w1, b1, w2, b2))
    ref = _reference(x, w1, b1, w2, b2)
    assert out.shape == (batch, 1)
    assert jnp.allclose(out, ref, atol=1e-5, rtol=1e-5)

    # Ragged batch: exercises the multi-step grid + last-block padding path.
    batch2 = 200
    x2 = jax.random.normal(kx2, (batch2, observation_dim), jnp.float32)
    out2 = jax.block_until_ready(
        termination_forward(x2, w1, b1, w2, b2, block_rows=64))
    ref2 = _reference(x2, w1, b1, w2, b2)
    assert out2.shape == (batch2, 1)
    assert jnp.allclose(out2, ref2, atol=1e-5, rtol=1e-5)

    print("KERNEL_OK")
</pallas_src>

<mosaic_0001>
module attributes {stable_mosaic.version = 11 : i64} {
  func.func @termination_kernel(%arg0: i32, %arg1: memref<8x16xf32, #tpu.memory_space<vmem>>, %arg2: memref<16x32xf32, #tpu.memory_space<vmem>>, %arg3: memref<1x32xf32, #tpu.memory_space<vmem>>, %arg4: memref<1x32xf32, #tpu.memory_space<vmem>>, %arg5: memref<1x1xf32, #tpu.memory_space<smem>>, %arg6: memref<8x1xf32, #tpu.memory_space<vmem>>) attributes {dimension_semantics = [#tpu.dimension_semantics<parallel>], iteration_bounds = array<i64: 1>, scalar_prefetch = 0 : i64, scratch_operands = 0 : i64, tpu.core_type = #tpu.core_type<tc>, window_params = [{transform_indices = @transform_0, window_bounds = array<i64: 8, 16>}, {pipeline_mode = #tpu.pipeline_mode<synchronous>, transform_indices = @transform_1, window_bounds = array<i64: 16, 32>}, {pipeline_mode = #tpu.pipeline_mode<synchronous>, transform_indices = @transform_2, window_bounds = array<i64: 1, 32>}, {pipeline_mode = #tpu.pipeline_mode<synchronous>, transform_indices = @transform_3, window_bounds = array<i64: 1, 32>}, {transform_indices = @transform_4, window_bounds = array<i64: 1, 1>}, {transform_indices = @transform_5, window_bounds = array<i64: 8, 1>}]} {
    %c0 = arith.constant 0 : index
    %c0_0 = arith.constant 0 : index
    %0 = vector.load %arg1[%c0, %c0_0] : memref<8x16xf32, #tpu.memory_space<vmem>>, vector<8x16xf32>
    %c0_1 = arith.constant 0 : index
    %c0_2 = arith.constant 0 : index
    %1 = vector.load %arg2[%c0_1, %c0_2] : memref<16x32xf32, #tpu.memory_space<vmem>>, vector<16x32xf32>
    %cst = arith.constant dense<0.000000e+00> : vector<8x32xf32>
    %2 = tpu.matmul %0, %1, %cst {dimension_numbers = #tpu.dot_dimension_numbers<[1], [0], [0], [1], [0, 0, 1, 1], [], []>} : vector<8x16xf32>, vector<16x32xf32>, vector<8x32xf32> -> vector<8x32xf32>
    %c0_3 = arith.constant 0 : index
    %c0_4 = arith.constant 0 : index
    %3 = vector.load %arg3[%c0_3, %c0_4] : memref<1x32xf32, #tpu.memory_space<vmem>>, vector<1x32xf32>
    %4 = vector.broadcast %3 : vector<1x32xf32> to vector<8x32xf32>
    %5 = arith.addf %2, %4 : vector<8x32xf32>
    %6 = math.tanh %5 : vector<8x32xf32>
    %c0_5 = arith.constant 0 : index
    %c0_6 = arith.constant 0 : index
    %7 = vector.load %arg4[%c0_5, %c0_6] : memref<1x32xf32, #tpu.memory_space<vmem>>, vector<1x32xf32>
    %8 = vector.broadcast %7 : vector<1x32xf32> to vector<8x32xf32>
    %9 = arith.mulf %6, %8 : vector<8x32xf32>
    %cst_7 = arith.constant dense<0.000000e+00> : vector<8xf32>
    %10 = vector.multi_reduction <add>, %9, %cst_7 [1] : vector<8x32xf32> to vector<8xf32>
    %11 = vector.shape_cast %10 : vector<8xf32> to vector<8x1xf32>
    %c0_8 = arith.constant 0 : index
    %c0_9 = arith.constant 0 : index
    %12 = memref.load %arg5[%c0_8, %c0_9] : memref<1x1xf32, #tpu.memory_space<smem>>
    %13 = vector.broadcast %12 : f32 to vector<8x1xf32>
    %14 = arith.addf %11, %13 : vector<8x1xf32>
    %15 = arith.negf %14 : vector<8x1xf32>
    %16 = math.exp %15 : vector<8x1xf32>
    %cst_10 = arith.constant 1.000000e+00 : f32
    %17 = vector.broadcast %cst_10 : f32 to vector<8x1xf32>
    %18 = arith.addf %17, %16 : vector<8x1xf32>
    %19 = arith.divf %17, %18 : vector<8x1xf32>
    %c0_11 = arith.constant 0 : index
    %c0_12 = arith.constant 0 : index
    %20 = vector.load %arg6[%c0_11, %c0_12] : memref<8x1xf32, #tpu.memory_space<vmem>>, vector<8x1xf32>
    tpu.vector_store %arg6[%c0_11, %c0_12], %19 {strides = array<i32>} : memref<8x1xf32, #tpu.memory_space<vmem>>, vector<8x1xf32>,
    return
  }
  func.func @transform_0(%arg0: i32) -> (i32, i32) {
    %c0_i32 = arith.constant 0 : i32
    %c0_i32_0 = arith.constant 0 : i32
    return %arg0, %c0_i32 : i32, i32
  }
  func.func @transform_1(%arg0: i32) -> (i32, i32) {
    %c0_i32 = arith.constant 0 : i32
    %c0_i32_0 = arith.constant 0 : i32
    %c0_i32_1 = arith.constant 0 : i32
    return %c0_i32, %c0_i32_0 : i32, i32
  }
  func.func @transform_2(%arg0: i32) -> (i32, i32) {
    %c0_i32 = arith.constant 0 : i32
    %c0_i32_0 = arith.constant 0 : i32
    %c0_i32_1 = arith.constant 0 : i32
    return %c0_i32, %c0_i32_0 : i32, i32
  }
  func.func @transform_3(%arg0: i32) -> (i32, i32) {
    %c0_i32 = arith.constant 0 : i32
    %c0_i32_0 = arith.constant 0 : i32
    %c0_i32_1 = arith.constant 0 : i32
    return %c0_i32, %c0_i32_0 : i32, i32
  }
  func.func @transform_4(%arg0: i32) -> (i32, i32) {
    %c0_i32 = arith.constant 0 : i32
    %c0_i32_0 = arith.constant 0 : i32
    %c0_i32_1 = arith.constant 0 : i32
    return %c0_i32, %c0_i32_0 : i32, i32
  }
  func.func @transform_5(%arg0: i32) -> (i32, i32) {
    %c0_i32 = arith.constant 0 : i32
    %c0_i32_0 = arith.constant 0 : i32
    return %arg0, %c0_i32 : i32, i32
  }
}

</mosaic_0001>

<bundles_post_ra>
// kernel: tpu_custom_call.1
= control target key start
LH: loop header
LB: loop body
LE: loop exit
PB: predicated region body
PF: predicated region fallthrough
CT: control target
= control target key end

     0   :  { %11 = vsyncpa [#allocation4], 0  ;;  %s285_s0 = inlined_call_operand.hbm [shape: f32[8,16], index: 0, kind: input, shape index: {}]   ;;  %s286_s1 = inlined_call_operand.hbm [shape: f32[16,32], index: 1, kind: input, shape index: {}]   ;;  %s287_s2 = inlined_call_operand.vmem [shape: f32[1,32], index: 2, kind: input, shape index: {}]   ;;  %s288_s3 = inlined_call_operand.vmem [shape: f32[1,32], index: 3, kind: input, shape index: {}]   ;;  %s289_s4 = inlined_call_operand.<no memory space> [shape: f32[1,1], index: 4, kind: input, shape index: {}]   ;;  %s290_s5 = inlined_call_operand.vmem [shape: f32[8,1], index: 5, kind: output, shape index: {}]  }
   0x1   :  { %12 = vsyncpa [#allocation6], 0  ;;  %s231_s18 = smov [#allocation3]   ;;  %s232_s20 = smov [#allocation5]  }
   0x2   :  { %s19_s19 = sshll.u32 %s231_s18, 4  ;;  %s28_s21 = sshll.u32 %s232_s20, 4  ;;  %s20_s19 = int_to_ptr.vmem [resolvable:$true] %s19_s19  ;;  %s29_s21 = int_to_ptr.vmem [resolvable:$true] %s28_s21 }
   0x3   :  { %s195_s22 = scalar_lea.vmem %s20_s19, 128  ;;  %p200_p1 = scmp.lt.s32.totalorder %s20_s19, %s20_s19 }
   0x4   :  { %p196_p0 = scmp.ne.s32.totalorder %s20_s19, %s195_s22  ;;  %p201_p2 = scmp.lt.s32.totalorder %s195_s22, %s195_s22 }
   0x6   :  { %p202_p3 = por %p201_p2, %p200_p1 }
   0x8   :  { %p203_p4 = pnand %p202_p3, %p196_p0 }
   0xa   :  { %206 = shalt.err (!%p203_p4)
}
   0xb   :  { %22 = dma.hbm_to_vmem [thread:$0]  %s285_s0, 128, %s20_s19, [#allocation4]  }
   0xc   :  { %s215_s25 = scalar_lea.vmem %s29_s21, 256  ;;  %p220_p6 = scmp.lt.s32.totalorder %s29_s21, %s29_s21 }
   0xd   :  { %p216_p5 = scmp.ne.s32.totalorder %s29_s21, %s215_s25  ;;  %p221_p7 = scmp.lt.s32.totalorder %s215_s25, %s215_s25 }
   0xf   :  { %p222_p8 = por %p221_p7, %p220_p6 }
  0x11   :  { %p223_p9 = pnand %p222_p8, %p216_p5 }
  0x13   :  { %226 = shalt.err (!%p223_p9)
}
  0x14   :  { %s233_s26 = smov 128   ;;  %s234_s27 = smov 8  }
  0x15   :  { %34 = dma.hbm_to_vmem [thread:$0]  %s286_s1, 256, %s29_s21, [#allocation6], %s233_s26, %s233_s26, %s234_s27  }
  0x16   :  { %227 = dma.done.wait [#allocation4], 128  }
  0x17   :  { %228 = vsyncadd [#allocation4], 4294967168 }
  0x18   :  { %229 = dma.done.wait [#allocation6], 256  }
  0x19   :  { %230 = vsyncadd [#allocation6], 4294967040  ;;  %v235_v0 = vmov 0.0   ;;  %vm236_vm0 = vmmov 0   ;;  %v49_v1 = vld [vmem:[#allocation5 + $0x8] sm:$0xff]  ;;  %v48_v2 = vld [vmem:[#allocation5] sm:$0xff]  ;;  %v145_v12 = vstv %s289_s4 }
  0x1a   :  { %168 = vmatprep.subr.mxu0 %v235_v0  ;;  %172 = vmatprep.mubr.msk.f32.mxu0 %vm236_vm0, %v235_v0  ;;  %v47_v3 = vld [vmem:[#allocation3] sm:$0xff]  ;;  %vm57_vm1 = vcmask 130048   ;;  %vm140_vm2 = vcmask 261120   ;;  %vm153_vm3 = vcmask 7168  }
  0x1b   :  { %169 = vmatpush3.msra.mxu0 %v49_v1  ;;  %v161_v4 = vld [vmem:[%s287_s2] ss:$0 sm:$0xff] }
  0x1c   :  { %170 = vmatprep.subr.mxu0 %v235_v0  ;;  %v163_v8 = vld [vmem:[%s288_s3] ss:$0 sm:$0xff] }
  0x1d   :  { %171 = vmatpush3.msra.mxu0 %v48_v2 }
  0x1e   :  { %173 = vmatmul.mubr.msk.f32.vlgmr.msra.gmra.mxu0 %vm57_vm1, %v47_v3 }
  0xde   :  { %v127_v5 = vpop.f32.mrf.mxu0 }
  0xdf   :  { %v128_v6 = vadd.f32 %v161_v4, %v127_v5 }
  0xe0   :  { %v174_v7 = vpop.f32.mrf.mxu0 }
  0xe1   :  { %181 = vtanh.f32 %v128_v6 }
  0xee   :  { %v182_v9 = vpop.eup %181 }
  0xef   :  { %v139_v10 = vmul.f32 %v182_v9, %v163_v8 }
  0xf1   :  { %v141_v11 = vsel %vm140_vm2, %v139_v10, 0.0 }
  0xf2   :  { %142 = vadd.xlane.f32.xlu0 %v141_v11 }
 0x17b   :  { %v143_v13 = vpop.xlane.xlu0 %142 }
 0x17c   :  { %v146_v14 = vadd.f32 %v145_v12, %v143_v13 }
 0x17e   :  { %v164_v15 = vmul.f32 -1.442695, %v146_v14 }
 0x180   :  { %183 = vpow2.f32 %v164_v15 }
 0x18d   :  { %v184_v16 = vpop.eup %183 }
 0x18e   :  { %v150_v17 = vadd.f32 1.0, %v184_v16 }
 0x190   :  { %185 = vrcp.f32 %v150_v17 }
 0x19d   :  { %v186_v18 = vpop.eup %185 }
 0x19e   :  { %154 = vst.msk [vmem:[%s290_s5] sm:$0xff] %vm153_vm3, %v186_v18 }
 0x19f   :  { %159 = vsyncpa [#allocation4], 1 }
 0x1a0   :  { %160 = vsyncpa [#allocation6], 1 }

</bundles_post_ra>
